<compile_context>
chip_gen: v6e
topology: v6e:2x2x1
jax: 0.10.0
libtpu: 0.0.40
codegen_flags: <defaults>
</compile_context>

<pallas_src>
import numpy as np
import jax
import jax.numpy as jnp
from jax import lax
from jax.experimental import pallas as pl
from jax.experimental.pallas import tpu as pltpu


def _round_up(x, m):
    return (x + m - 1) // m * m


def _cdiv(a, b):
    return -(-a // b)


# ---------------------------------------------------------------------------
# L1 (MAE): stream dense (RB, 2048) f32 blocks, accumulate |p - t| per lane,
# final mean on host.  Tail is zero-padded (|0-0| = 0) -> no masking needed.
# ---------------------------------------------------------------------------
def l1_mean(p2d, t2d):
    N = int(np.prod(p2d.shape))
    TL = 2048
    rows = _cdiv(N, TL)
    NP = 2 if rows >= 16 else 1               # parallel split (v7x megacore)
    RB = min(128, _round_up(_cdiv(rows, NP), 8))   # ~1 MiB per input per step
    NB = _cdiv(_cdiv(rows, NP), RB)
    rows_pad = NP * NB * RB
    pad = rows_pad * TL - N

    pp = jnp.pad(p2d.reshape(-1), (0, pad)).reshape(NP, NB * RB, TL)
    tt = jnp.pad(t2d.reshape(-1), (0, pad)).reshape(NP, NB * RB, TL)

    def kernel(p_ref, t_ref, acc_ref):
        @pl.when(pl.program_id(1) == 0)
        def _():
            acc_ref[...] = jnp.zeros_like(acc_ref)

        d = jnp.abs(p_ref[0] - t_ref[0])                       # (RB, TL) f32
        acc_ref[...] += jnp.sum(d, axis=0, keepdims=True)[None]

    acc = pl.pallas_call(
        kernel,
        out_shape=jax.ShapeDtypeStruct((NP, 1, TL), jnp.float32),
        grid_spec=pltpu.PrefetchScalarGridSpec(
            num_scalar_prefetch=0,
            grid=(NP, NB),
            in_specs=[pl.BlockSpec((1, RB, TL), lambda i, b: (i, b, 0)),
                      pl.BlockSpec((1, RB, TL), lambda i, b: (i, b, 0))],
            out_specs=pl.BlockSpec((1, 1, TL), lambda i, b: (i, 0, 0)),
        ),
        compiler_params=pltpu.CompilerParams(
            dimension_semantics=("parallel", "arbitrary")),
    )(pp, tt)
    return jnp.sum(acc) / N


# ---------------------------------------------------------------------------
# Fused windowed-DFT weight.
# Audio is viewed as rows of L samples (L = max(hop, 128)); g = L // hop frame
# starts per row; a frame spans n_shift consecutive rows.  Weight row index
# kappa = j*hop + n (j = in-row offset, n = sample index inside the frame).
# Columns are grouped in blocks of 256 = [win*cos (128-padded) | -win*sin],
# group q = j*n_ftiles + ft.  Padded freq / out-of-range rows are zero.
# ---------------------------------------------------------------------------
def _stft_weight(scale, hop, L, n_shift, g, n_freq, n_ftiles):
    K = n_shift * L
    N = g * n_ftiles * 256
    win = np.hanning(scale)                       # matches the module's window
    n_pos = np.arange(scale)
    W = np.zeros((K, N), np.float32)
    for j in range(g):
        rows = j * hop + n_pos                    # all < K by construction
        for ft in range(n_ftiles):
            f0 = ft * 128
            f1 = min(f0 + 128, n_freq)
            nf = f1 - f0
            if nf <= 0:
                continue
            k = np.arange(f0, f1)
            ang = 2.0 * np.pi * np.outer(n_pos, k) / scale
            base = (j * n_ftiles + ft) * 256
            W[rows, base:base + nf] = win[:, None] * np.cos(ang)
            W[rows, base + 128:base + 128 + nf] = -(win[:, None] * np.sin(ang))
    return jnp.asarray(W, dtype=jnp.bfloat16)


# ---------------------------------------------------------------------------
# Per-scale STFT loss (lin + log terms, summed; mean taken on host).
# Grid = (R parallel, frame-row tiles arbitrary).  Each step fetches a
# (TM, L) row block + an 8-row halo per tensor, builds the concatenated-K
# frame matrix once, and sweeps all freq/offset groups against the resident
# weight with single K-wide MXU matmuls (f32 accumulation).
# ---------------------------------------------------------------------------
def stft_scale_loss(p_bf, t_bf, T, scale, overlap=0.75):
    R, T_pad = p_bf.shape
    hop = int((1.0 - overlap) * scale)
    assert hop > 0 and scale % hop == 0, "overlap must give hop dividing scale"
    assert T >= scale, "audio shorter than FFT size"
    L = hop if hop >= 128 else 128                # dense-lane row width
    assert L % hop == 0 and T_pad % L == 0
    g = L // hop                                  # frame starts per row
    n_shift = _cdiv(scale + (g - 1) * hop, L)     # rows a frame can span
    K = n_shift * L
    assert (g - 1) * hop + scale <= K

    n_frames = 1 + (T - scale) // hop             # torch.stft, center=False
    n_freq = scale // 2 + 1                       # onesided
    n_ftiles = _cdiv(n_freq, 128)
    n_groups = g * n_ftiles

    C = T_pad // L
    pc = p_bf.reshape(R, C, L)                    # free row-major view
    tc = t_bf.reshape(R, C, L)

    needed_rows = (n_frames - 1) // g + 1
    TM = min(256 if L >= 512 else 512, _round_up(needed_rows, 8))
    n_mtiles = _cdiv(needed_rows, TM)
    tm8 = TM // 8
    halo_max = C // 8 - 1                         # keep halo block in bounds
    need_mask = (n_mtiles * TM * g != n_frames)

    W = _stft_weight(scale, hop, L, n_shift, g, n_freq, n_ftiles)
    NW = W.shape[1]

    def kernel(pm_ref, ph_ref, tm_ref, th_ref, w_ref, acc_ref):
        @pl.when(pl.program_id(1) == 0)
        def _():
            acc_ref[...] = jnp.zeros_like(acc_ref)

        cp = pm_ref[0]            # (TM, L) bf16 rows [m*TM, m*TM+TM)
        hp = ph_ref[0]            # (8, L)  bf16 halo rows (next 8)
        ct = tm_ref[0]
        ht = th_ref[0]

        def build(main, halo):    # concatenated-K frame matrix (TM, K)
            parts = [main]
            for c in range(1, n_shift):
                parts.append(jnp.concatenate([main[c:, :], halo[:c, :]],
                                             axis=0))
            return jnp.concatenate(parts, axis=1)

        xp = build(cp, hp)
        xt = build(ct, ht)

        if need_mask:
            row_ids = (pl.program_id(1) * TM
                       + lax.broadcasted_iota(jnp.int32, (TM, 1), 0))
            frame0 = row_ids * g

        total = jnp.zeros((1, 128), jnp.float32)
        for q in range(n_groups):                 # offset/freq-tile groups
            wq = w_ref[:, q * 256:(q + 1) * 256]
            rp = jnp.dot(xp, wq, preferred_element_type=jnp.float32)
            rt = jnp.dot(xt, wq, preferred_element_type=jnp.float32)
            re_p, im_p = rp[:, :128], rp[:, 128:]
            re_t, im_t = rt[:, :128], rt[:, 128:]
            pw_p = re_p * re_p + im_p * im_p      # amp() = re^2 + im^2
            pw_t = re_t * re_t + im_t * im_t
            lin = jnp.abs(pw_t - pw_p)
            lg = jnp.abs(jnp.log((pw_t + 1e-4) / (pw_p + 1e-4)))  # single log
            val = lin + lg                        # same mean denominator
            if need_mask:                         # frames beyond n_frames
                j = q // n_ftiles
                valid = (frame0 + j) < n_frames
                val = jnp.where(valid, val, 0.0)
            total = total + jnp.sum(val, axis=0, keepdims=True)

        acc_ref[...] += total[None]

    def main_map(r, m):
        return (r, m, 0)

    def halo_map(r, m):
        # clamped: valid frames never need halo rows once clamping triggers
        # (audio buffer is zero-padded by >= 4096 samples past the last frame).
        return (r, jnp.minimum((m + 1) * tm8, halo_max), 0)

    def w_map(r, m):
        return (0, 0)             # full weight resident, fetched once

    acc = pl.pallas_call(
        kernel,
        out_shape=jax.ShapeDtypeStruct((R, 1, 128), jnp.float32),
        grid_spec=pltpu.PrefetchScalarGridSpec(
            num_scalar_prefetch=0,
            grid=(R, n_mtiles),
            in_specs=[pl.BlockSpec((1, TM, L), main_map),
                      pl.BlockSpec((1, 8, L), halo_map),
                      pl.BlockSpec((1, TM, L), main_map),
                      pl.BlockSpec((1, 8, L), halo_map),
                      pl.BlockSpec((K, NW), w_map)],
            out_specs=pl.BlockSpec((1, 1, 128), lambda r, m: (r, 0, 0)),
        ),
        compiler_params=pltpu.CompilerParams(
            dimension_semantics=("parallel", "arbitrary"),
            vmem_limit_bytes=(40 * 1024 * 1024) if scale >= 2048 else None,
        ),
    )(pc, pc, tc, tc, W)

    count = R * n_frames * n_freq                 # true element count
    return jnp.sum(acc) / count                   # lin_mean + log_mean


# ---------------------------------------------------------------------------
# HybridLoss forward:  L1(predict, target) + 0.1 * MRSTFT(predict, target)
# ---------------------------------------------------------------------------
SCALES = [2048, 512, 128, 32]
OVERLAP = 0.75


def hybrid_loss(predict, target, scales=SCALES, overlap=OVERLAP):
    T = predict.shape[-1]
    p2d = predict.reshape(-1, T).astype(jnp.float32)
    t2d = target.reshape(-1, T).astype(jnp.float32)

    # --- L1 / MAE (f32) ---
    mae = l1_mean(p2d, t2d)

    # --- one padded bf16 buffer per tensor, shared by all STFT scales ---
    # (+4096 zeros guarantee halo rows of any valid frame are real zeros)
    T_pad = _round_up(T, 512) + 4096
    pad = T_pad - T
    p_bf = jnp.pad(p2d, ((0, 0), (0, pad))).astype(jnp.bfloat16)
    t_bf = jnp.pad(t2d, ((0, 0), (0, pad))).astype(jnp.bfloat16)

    total = jnp.float32(0.0)
    for s in scales:
        total = total + stft_scale_loss(p_bf, t_bf, T, s, overlap)
    mrstft = total / len(scales)

    return mae + 0.1 * mrstft


if __name__ == "__main__":
    key = jax.random.PRNGKey(0)
    kp, kt = jax.random.split(key)
    B, C, T = 2, 1, 4096                 # T >= 2048 so the largest scale fits
    predict = jax.random.normal(kp, (B, C, T), dtype=jnp.float32)
    target = jax.random.normal(kt, (B, C, T), dtype=jnp.float32)

    loss = hybrid_loss(predict, target)
    jax.block_until_ready(loss)
    print("KERNEL_OK")
</pallas_src>

<mosaic_0001>
module attributes {stable_mosaic.version = 11 : i64} {
  func.func @kernel(%arg0: i32, %arg1: i32, %arg2: memref<1x8x2048xf32, #tpu.memory_space<vmem>>, %arg3: memref<1x8x2048xf32, #tpu.memory_space<vmem>>, %arg4: memref<1x1x2048xf32, #tpu.memory_space<vmem>>) attributes {dimension_semantics = [#tpu.dimension_semantics<parallel>, #tpu.dimension_semantics<arbitrary>], iteration_bounds = array<i64: 1, 1>, scalar_prefetch = 0 : i64, scratch_operands = 0 : i64, tpu.core_type = #tpu.core_type<tc>, window_params = [{transform_indices = @transform_0, window_bounds = array<i64: 1, 8, 2048>}, {transform_indices = @transform_1, window_bounds = array<i64: 1, 8, 2048>}, {transform_indices = @transform_2, window_bounds = array<i64: 1, 1, 2048>}]} {
    %c0_i32 = arith.constant 0 : i32
    %0 = arith.cmpi eq, %arg1, %c0_i32 : i32
    %1 = arith.extui %0 : i1 to i32
    %c0_i32_0 = arith.constant 0 : i32
    %2 = arith.cmpi ne, %1, %c0_i32_0 : i32
    scf.if %2 {
      %cst_12 = arith.constant 0.000000e+00 : f32
      %15 = vector.broadcast %cst_12 : f32 to vector<1x1x2048xf32>
      %c0_13 = arith.constant 0 : index
      %c0_14 = arith.constant 0 : index
      %c0_15 = arith.constant 0 : index
      %16 = vector.load %arg4[%c0_13, %c0_14, %c0_15] : memref<1x1x2048xf32, #tpu.memory_space<vmem>>, vector<1x1x2048xf32>
      tpu.vector_store %arg4[%c0_13, %c0_14, %c0_15], %15 {strides = array<i32>} : memref<1x1x2048xf32, #tpu.memory_space<vmem>>, vector<1x1x2048xf32>,
    } else {
    }
    %c0 = arith.constant 0 : index
    %c0_1 = arith.constant 0 : index
    %c0_2 = arith.constant 0 : index
    %3 = vector.load %arg2[%c0, %c0_1, %c0_2] : memref<1x8x2048xf32, #tpu.memory_space<vmem>>, vector<1x8x2048xf32>
    %4 = vector.shape_cast %3 : vector<1x8x2048xf32> to vector<8x2048xf32>
    %c0_3 = arith.constant 0 : index
    %c0_4 = arith.constant 0 : index
    %c0_5 = arith.constant 0 : index
    %5 = vector.load %arg3[%c0_3, %c0_4, %c0_5] : memref<1x8x2048xf32, #tpu.memory_space<vmem>>, vector<1x8x2048xf32>
    %6 = vector.shape_cast %5 : vector<1x8x2048xf32> to vector<8x2048xf32>
    %7 = arith.subf %4, %6 : vector<8x2048xf32>
    %8 = math.absf %7 : vector<8x2048xf32>
    %c0_6 = arith.constant 0 : index
    %c0_7 = arith.constant 0 : index
    %c0_8 = arith.constant 0 : index
    %9 = vector.load %arg4[%c0_6, %c0_7, %c0_8] : memref<1x1x2048xf32, #tpu.memory_space<vmem>>, vector<1x1x2048xf32>
    %cst = arith.constant dense<0.000000e+00> : vector<2048xf32>
    %10 = vector.multi_reduction <add>, %8, %cst [0] : vector<8x2048xf32> to vector<2048xf32>
    %11 = vector.shape_cast %10 : vector<2048xf32> to vector<1x2048xf32>
    %12 = vector.shape_cast %11 : vector<1x2048xf32> to vector<1x1x2048xf32>
    %13 = arith.addf %9, %12 : vector<1x1x2048xf32>
    %c0_9 = arith.constant 0 : index
    %c0_10 = arith.constant 0 : index
    %c0_11 = arith.constant 0 : index
    %14 = vector.load %arg4[%c0_9, %c0_10, %c0_11] : memref<1x1x2048xf32, #tpu.memory_space<vmem>>, vector<1x1x2048xf32>
    tpu.vector_store %arg4[%c0_9, %c0_10, %c0_11], %13 {strides = array<i32>} : memref<1x1x2048xf32, #tpu.memory_space<vmem>>, vector<1x1x2048xf32>,
    return
  }
  func.func @transform_0(%arg0: i32, %arg1: i32) -> (i32, i32, i32) {
    %c0_i32 = arith.constant 0 : i32
    %c0_i32_0 = arith.constant 0 : i32
    return %arg0, %arg1, %c0_i32 : i32, i32, i32
  }
  func.func @transform_1(%arg0: i32, %arg1: i32) -> (i32, i32, i32) {
    %c0_i32 = arith.constant 0 : i32
    %c0_i32_0 = arith.constant 0 : i32
    return %arg0, %arg1, %c0_i32 : i32, i32, i32
  }
  func.func @transform_2(%arg0: i32, %arg1: i32) -> (i32, i32, i32) {
    %c0_i32 = arith.constant 0 : i32
    %c0_i32_0 = arith.constant 0 : i32
    %c0_i32_1 = arith.constant 0 : i32
    return %arg0, %c0_i32, %c0_i32_0 : i32, i32, i32
  }
}

</mosaic_0001>

<bundles_post_ra>
// kernel: tpu_custom_call.1
= control target key start
LH: loop header
LB: loop body
LE: loop exit
PB: predicated region body
PF: predicated region fallthrough
CT: control target
= control target key end

     0   :  { %7 = vsyncpa [#allocation3], 0  ;;  %s453_s0 = inlined_call_operand.hbm [shape: f32[1,8,2048], index: 0, kind: input, shape index: {}]   ;;  %s454_s1 = inlined_call_operand.hbm [shape: f32[1,8,2048], index: 1, kind: input, shape index: {}]   ;;  %s455_s2 = inlined_call_operand.hbm [shape: f32[1,1,2048], index: 2, kind: output, shape index: {}]  }
   0x1   :  { %8 = vsyncpa [#allocation6], 0 }
   0x2   :  { %9 = vsyncpa [#allocation4], 0  ;;  %s411_s9 = smov [#allocation2]   ;;  %s412_s11 = smov [#allocation5]  }
   0x3   :  { %s16_s10 = sshll.u32 %s411_s9, 4  ;;  %s26_s12 = sshll.u32 %s412_s11, 4  ;;  %s17_s10 = int_to_ptr.vmem [resolvable:$true] %s16_s10  ;;  %s27_s12 = int_to_ptr.vmem [resolvable:$true] %s26_s12 }
   0x4   :  { %s353_s13 = scalar_lea.vmem %s17_s10, 2048  ;;  %p358_p1 = scmp.lt.s32.totalorder %s17_s10, %s17_s10 }
   0x5   :  { %p354_p0 = scmp.ne.s32.totalorder %s17_s10, %s353_s13  ;;  %p359_p2 = scmp.lt.s32.totalorder %s353_s13, %s353_s13 }
   0x7   :  { %p360_p3 = por %p359_p2, %p358_p1 }
   0x9   :  { %p361_p4 = pnand %p360_p3, %p354_p0 }
   0xb   :  { %364 = shalt.err (!%p361_p4)
}
   0xc   :  { %19 = dma.hbm_to_vmem [thread:$0]  %s453_s0, 2048, %s17_s10, [#allocation3]  }
   0xd   :  { %s373_s16 = scalar_lea.vmem %s27_s12, 2048  ;;  %p378_p6 = scmp.lt.s32.totalorder %s27_s12, %s27_s12 }
   0xe   :  { %p374_p5 = scmp.ne.s32.totalorder %s27_s12, %s373_s16  ;;  %p379_p7 = scmp.lt.s32.totalorder %s373_s16, %s373_s16 }
  0x10   :  { %p380_p8 = por %p379_p7, %p378_p6 }
  0x12   :  { %p381_p9 = pnand %p380_p8, %p374_p5 }
  0x14   :  { %384 = shalt.err (!%p381_p9)
}
  0x15   :  { %29 = dma.hbm_to_vmem [thread:$0]  %s454_s1, 2048, %s27_s12, [#allocation6]  }
  0x16   :  { %405 = dma.done.wait [#allocation3], 2048  }
  0x17   :  { %406 = vsyncadd [#allocation3], 4294965248 }
  0x18   :  { %407 = dma.done.wait [#allocation6], 2048  }
  0x19   :  { %408 = vsyncadd [#allocation6], 4294965248  ;;  %v413_v0 = vmov 1966171168   ;;  %v227_v2 = vlaneseq  ;;  %v42_v3 = vld [vmem:[#allocation2] sm:$0xff]  ;;  %v43_v4 = vld [vmem:[#allocation2 + $0x8] sm:$0xff] }
  0x1a   :  { %v225_v1 = vunpack.c.l.s4 %v413_v0  ;;  %v44_v5 = vld [vmem:[#allocation2 + $0x10] sm:$0xff]  ;;  %v45_v6 = vld [vmem:[#allocation2 + $0x18] sm:$0xff]  ;;  %v46_v7 = vld [vmem:[#allocation2 + $0x20] sm:$0xff]  ;;  %s414_s0 = smov [#allocation7]  }
  0x1b   :  { %v47_v8 = vld [vmem:[#allocation2 + $0x28] sm:$0xff]  ;;  %v48_v9 = vld [vmem:[#allocation2 + $0x30] sm:$0xff]  ;;  %v49_v10 = vld [vmem:[#allocation2 + $0x38] sm:$0xff]  ;;  %v228_v17 = vshrl.u32 %v227_v2, 7  ;;  %s330_s1 = sshll.u32 %s414_s0, 4  ;;  %s331_s1 = int_to_ptr.vmem [resolvable:$true] %s330_s1 }
  0x1c   :  { %v58_v11 = vld [vmem:[#allocation5] sm:$0xff]  ;;  %v59_v12 = vld [vmem:[#allocation5 + $0x8] sm:$0xff]  ;;  %v60_v13 = vld [vmem:[#allocation5 + $0x10] sm:$0xff]  ;;  %v226_v16 = vunpack.c.0.s8 %v225_v1  ;;  %s385_s19 = scalar_lea.vmem %s331_s1, 256  ;;  %p390_p11 = scmp.lt.s32.totalorder %s331_s1, %s331_s1 }
  0x1d   :  { %v61_v14 = vld [vmem:[#allocation5 + $0x18] sm:$0xff]  ;;  %v74_v15 = vsub.f32 %v42_v3, %v58_v11  ;;  %v62_v18 = vld [vmem:[#allocation5 + $0x20] sm:$0xff]  ;;  %v63_v19 = vld [vmem:[#allocation5 + $0x28] sm:$0xff]  ;;  %v75_v21 = vsub.f32 %v43_v4, %v59_v12  ;;  %v76_v22 = vsub.f32 %v44_v5, %v60_v13  ;;  %p386_p10 = scmp.ne.s32.totalorder %s331_s1, %s385_s19  ;;  %p391_p12 = scmp.lt.s32.totalorder %s385_s19, %s385_s19 }
  0x1e   :  { %v64_v20 = vld [vmem:[#allocation5 + $0x30] sm:$0xff]  ;;  %v77_v23 = vsub.f32 %v45_v6, %v61_v14  ;;  %v65_v24 = vld [vmem:[#allocation5 + $0x38] sm:$0xff]  ;;  %v78_v25 = vsub.f32 %v46_v7, %v62_v18  ;;  %v79_v26 = vsub.f32 %v47_v8, %v63_v19  ;;  %v436_v36 = vsub.s32 %v226_v16, %v228_v17  ;;  %v50_v5 = vld [vmem:[#allocation2 + $0x40] sm:$0xff] }
  0x1f   :  { %v80_v27 = vsub.f32 %v48_v9, %v64_v20  ;;  %v90_v28 = vand.u32 2147483647, %v74_v15  ;;  %v81_v29 = vsub.f32 %v49_v10, %v65_v24  ;;  %v91_v30 = vand.u32 2147483647, %v75_v21  ;;  %v51_v10 = vld [vmem:[#allocation2 + $0x48] sm:$0xff]  ;;  %v52_v11 = vld [vmem:[#allocation2 + $0x50] sm:$0xff]  ;;  %p392_p13 = por %p391_p12, %p390_p11 }
  0x20   :  { %v92_v31 = vand.u32 2147483647, %v76_v22  ;;  %v93_v32 = vand.u32 2147483647, %v77_v23  ;;  %v94_v33 = vand.u32 2147483647, %v78_v25 }
  0x21   :  { %v95_v34 = vand.u32 2147483647, %v79_v26  ;;  %v96_v35 = vand.u32 2147483647, %v80_v27  ;;  %v97_v37 = vand.u32 2147483647, %v81_v29  ;;  %p393_p0 = pnand %p392_p13, %p386_p10 }
  0x22   :  { %v108_v38 = vrot.slane %v90_v28, 4  ;;  %v114_v39 = vrot.slane %v91_v30, 4  ;;  %v120_v40 = vrot.slane %v92_v31, 4  ;;  %v126_v41 = vrot.slane %v93_v32, 4  ;;  %v53_v12 = vld [vmem:[#allocation2 + $0x58] sm:$0xff]  ;;  %v54_v17 = vld [vmem:[#allocation2 + $0x60] sm:$0xff] }
  0x23   :  { %v132_v42 = vrot.slane %v94_v33, 4  ;;  %v138_v43 = vrot.slane %v95_v34, 4  ;;  %v144_v44 = vrot.slane %v96_v35, 4  ;;  %v150_v48 = vrot.slane %v97_v37, 4  ;;  %v66_v18 = vld [vmem:[#allocation5 + $0x40] sm:$0xff]  ;;  %v67_v19 = vld [vmem:[#allocation5 + $0x48] sm:$0xff] }
  0x24   :  { %v109_v45 = vadd.f32 %v108_v38, %v90_v28  ;;  %v115_v46 = vadd.f32 %v114_v39, %v91_v30  ;;  %v121_v47 = vadd.f32 %v120_v40, %v92_v31  ;;  %v127_v49 = vadd.f32 %v126_v41, %v93_v32  ;;  %v55_v24 = vld [vmem:[#allocation2 + $0x68] sm:$0xff]  ;;  %v68_v25 = vld [vmem:[#allocation5 + $0x50] sm:$0xff]  ;;  %v69_v26 = vld [vmem:[#allocation5 + $0x58] sm:$0xff] }
  0x25   :  { %v133_v50 = vadd.f32 %v132_v42, %v94_v33  ;;  %v139_v51 = vadd.f32 %v138_v43, %v95_v34  ;;  %v145_v52 = vadd.f32 %v144_v44, %v96_v35  ;;  %v151_v56 = vadd.f32 %v150_v48, %v97_v37  ;;  %v56_v31 = vld [vmem:[#allocation2 + $0x70] sm:$0xff]  ;;  %v70_v32 = vld [vmem:[#allocation5 + $0x60] sm:$0xff]  ;;  %v71_v33 = vld [vmem:[#allocation5 + $0x68] sm:$0xff] }
  0x26   :  { %v110_v53 = vrot.slane %v109_v45, 2  ;;  %v116_v54 = vrot.slane %v115_v46, 2  ;;  %v122_v55 = vrot.slane %v121_v47, 2  ;;  %v128_v57 = vrot.slane %v127_v49, 2  ;;  %v57_v37 = vld [vmem:[#allocation2 + $0x78] sm:$0xff]  ;;  %v72_v38 = vld [vmem:[#allocation5 + $0x70] sm:$0xff] }
  0x27   :  { %v134_v58 = vrot.slane %v133_v50, 2  ;;  %v140_v59 = vrot.slane %v139_v51, 2  ;;  %v146_v60 = vrot.slane %v145_v52, 2  ;;  %v152_v0 = vrot.slane %v151_v56, 2  ;;  %v73_v39 = vld [vmem:[#allocation5 + $0x78] sm:$0xff] }
  0x28   :  { %v111_v61 = vadd.f32 %v110_v53, %v109_v45  ;;  %v117_v62 = vadd.f32 %v116_v54, %v115_v46  ;;  %v123_v63 = vadd.f32 %v122_v55, %v121_v47  ;;  %v129_v1 = vadd.f32 %v128_v57, %v127_v49 }
  0x29   :  { %v135_v2 = vadd.f32 %v134_v58, %v133_v50  ;;  %v141_v3 = vadd.f32 %v140_v59, %v139_v51  ;;  %v147_v4 = vadd.f32 %v146_v60, %v145_v52  ;;  %v153_v9 = vadd.f32 %v152_v0, %v151_v56 }
  0x2a   :  { %v112_v6 = vrot.slane %v111_v61, 1  ;;  %v118_v7 = vrot.slane %v117_v62, 1  ;;  %v124_v8 = vrot.slane %v123_v63, 1  ;;  %v130_v13 = vrot.slane %v129_v1, 1 }
  0x2b   :  { %v136_v14 = vrot.slane %v135_v2, 1  ;;  %v142_v15 = vrot.slane %v141_v3, 1  ;;  %v148_v16 = vrot.slane %v147_v4, 1  ;;  %v154_v23 = vrot.slane %v153_v9, 1 }
  0x2c   :  { %v113_v20 = vadd.f32 %v112_v6, %v111_v61  ;;  %v119_v21 = vadd.f32 %v118_v7, %v117_v62  ;;  %v125_v22 = vadd.f32 %v124_v8, %v123_v63  ;;  %v131_v27 = vadd.f32 %v130_v13, %v129_v1 }
  0x2d   :  { %v137_v28 = vadd.f32 %v136_v14, %v135_v2  ;;  %v143_v29 = vadd.f32 %v142_v15, %v141_v3  ;;  %v149_v30 = vadd.f32 %v148_v16, %v147_v4  ;;  %v155_v34 = vadd.f32 %v154_v23, %v153_v9 }
  0x2e   :  { %v220_v35 = vcombine.low %v113_v20, %v119_v21  ;;  %v82_v40 = vsub.f32 %v50_v5, %v66_v18  ;;  %v83_v41 = vsub.f32 %v51_v10, %v67_v19  ;;  %v221_v42 = vcombine.low %v125_v22, %v131_v27 }
  0x2f   :  { %v222_v43 = vcombine.low %v137_v28, %v143_v29  ;;  %v84_v44 = vsub.f32 %v52_v11, %v68_v25  ;;  %v85_v45 = vsub.f32 %v53_v12, %v69_v26  ;;  %v223_v46 = vcombine.low %v149_v30, %v155_v34 }
  0x30   :  { %v230_v47 = vrot.slane %v220_v35, %v436_v36  ;;  %v86_v48 = vsub.f32 %v54_v17, %v70_v32  ;;  %v87_v49 = vsub.f32 %v55_v24, %v71_v33  ;;  %v237_v50 = vrot.slane %v221_v42, %v436_v36 }
  0x31   :  { %v244_v51 = vrot.slane %v222_v43, %v436_v36  ;;  %v88_v52 = vsub.f32 %v56_v31, %v72_v38  ;;  %v89_v53 = vsub.f32 %v57_v37, %v73_v39  ;;  %v251_v54 = vrot.slane %v223_v46, %v436_v36 }
  0x32   :  { %v98_v55 = vand.u32 2147483647, %v82_v40  ;;  %v99_v56 = vand.u32 2147483647, %v83_v41  ;;  %v100_v57 = vand.u32 2147483647, %v84_v44  ;;  %v252_v58 = vcombine.low %v230_v47, %v237_v50 }
  0x33   :  { %v101_v59 = vand.u32 2147483647, %v85_v45  ;;  %v102_v60 = vand.u32 2147483647, %v86_v48  ;;  %v103_v61 = vand.u32 2147483647, %v87_v49  ;;  %v253_v62 = vcombine.low %v244_v51, %v251_v54 }
  0x34   :  { %v104_v63 = vand.u32 2147483647, %v88_v52  ;;  %v105_v0 = vand.u32 2147483647, %v89_v53  ;;  %v156_v1 = vrot.slane %v98_v55, 4  ;;  %v260_v2 = vrot.slane %v252_v58, %v436_v36 }
  0x35   :  { %v162_v3 = vrot.slane %v99_v56, 4  ;;  %v168_v4 = vrot.slane %v100_v57, 4  ;;  %v174_v5 = vrot.slane %v101_v59, 4  ;;  %v267_v6 = vrot.slane %v253_v62, %v436_v36 }
  0x36   :  { %v157_v7 = vadd.f32 %v156_v1, %v98_v55  ;;  %v180_v8 = vrot.slane %v102_v60, 4  ;;  %v186_v9 = vrot.slane %v103_v61, 4  ;;  %v192_v13 = vrot.slane %v104_v63, 4 }
  0x37   :  { %v163_v10 = vadd.f32 %v162_v3, %v99_v56  ;;  %v169_v11 = vadd.f32 %v168_v4, %v100_v57  ;;  %v175_v12 = vadd.f32 %v174_v5, %v101_v59  ;;  %v268_v14 = vcombine.low %v260_v2, %v267_v6 }
  0x38   :  { %v158_v15 = vrot.slane %v157_v7, 2  ;;  %v181_v16 = vadd.f32 %v180_v8, %v102_v60  ;;  %v187_v17 = vadd.f32 %v186_v9, %v103_v61  ;;  %v193_v21 = vadd.f32 %v192_v13, %v104_v63 }
  0x39   :  { %v164_v18 = vrot.slane %v163_v10, 2  ;;  %v170_v19 = vrot.slane %v169_v11, 2  ;;  %v176_v20 = vrot.slane %v175_v12, 2  ;;  %322 = vst [vmem:[#allocation7] sm:$0xff] %v268_v14  ;;  %v198_v32 = vrot.slane %v105_v0, 4 }
  0x3a   :  { %v159_v22 = vadd.f32 %v158_v15, %v157_v7  ;;  %v182_v23 = vrot.slane %v181_v16, 2  ;;  %v188_v24 = vrot.slane %v187_v17, 2  ;;  %v194_v28 = vrot.slane %v193_v21, 2 }
  0x3b   :  { %v165_v25 = vadd.f32 %v164_v18, %v163_v10  ;;  %v171_v26 = vadd.f32 %v170_v19, %v169_v11  ;;  %v177_v27 = vadd.f32 %v176_v20, %v175_v12  ;;  %v199_v41 = vadd.f32 %v198_v32, %v105_v0 }
  0x3c   :  { %v160_v29 = vrot.slane %v159_v22, 1  ;;  %v183_v30 = vadd.f32 %v182_v23, %v181_v16  ;;  %v189_v31 = vadd.f32 %v188_v24, %v187_v17  ;;  %v195_v37 = vadd.f32 %v194_v28, %v193_v21 }
  0x3d   :  { %v166_v33 = vrot.slane %v165_v25, 1  ;;  %v172_v34 = vrot.slane %v171_v26, 1  ;;  %v178_v35 = vrot.slane %v177_v27, 1  ;;  %v200_v48 = vrot.slane %v199_v41, 2 }
  0x3e   :  { %v161_v38 = vadd.f32 %v160_v29, %v159_v22  ;;  %v184_v39 = vrot.slane %v183_v30, 1  ;;  %v190_v40 = vrot.slane %v189_v31, 1  ;;  %v196_v45 = vrot.slane %v195_v37, 1 }
  0x3f   :  { %v167_v42 = vadd.f32 %v166_v33, %v165_v25  ;;  %v173_v43 = vadd.f32 %v172_v34, %v171_v26  ;;  %v179_v44 = vadd.f32 %v178_v35, %v177_v27  ;;  %v201_v51 = vadd.f32 %v200_v48, %v199_v41 }
  0x40   :  { %v185_v46 = vadd.f32 %v184_v39, %v183_v30  ;;  %v191_v47 = vadd.f32 %v190_v40, %v189_v31  ;;  %v197_v52 = vadd.f32 %v196_v45, %v195_v37 }
  0x41   :  { %v269_v49 = vcombine.low %v161_v38, %v167_v42  ;;  %v270_v50 = vcombine.low %v173_v43, %v179_v44  ;;  %v202_v53 = vrot.slane %v201_v51, 1 }
  0x42   :  { %v271_v54 = vcombine.low %v185_v46, %v191_v47 }
  0x43   :  { %v279_v55 = vrot.slane %v269_v49, %v436_v36  ;;  %v286_v56 = vrot.slane %v270_v50, %v436_v36  ;;  %v203_v57 = vadd.f32 %v202_v53, %v201_v51 }
  0x44   :  { %v293_v59 = vrot.slane %v271_v54, %v436_v36 }
  0x45   :  { %v272_v58 = vcombine.low %v197_v52, %v203_v57  ;;  %v301_v60 = vcombine.low %v279_v55, %v286_v56 }
  0x47   :  { %v300_v61 = vrot.slane %v272_v58, %v436_v36  ;;  %v309_v63 = vrot.slane %v301_v60, %v436_v36 }
  0x49   :  { %v302_v62 = vcombine.low %v293_v59, %v300_v61 }
  0x4b   :  { %v316_v0 = vrot.slane %v302_v62, %v436_v36 }
  0x4d   :  { %v317_v1 = vcombine.low %v309_v63, %v316_v0 }
  0x4f   :  { %323 = vst [vmem:[#allocation7 + $0x8] sm:$0xff] %v317_v1 }
  0x50   :  { %396 = shalt.err (!%p393_p0)
}
  0x51   :  { %333 = dma.vmem_to_hbm [thread:$0]  %s331_s1, 256, %s455_s2, [#allocation4]  }
  0x52   :  { %409 = dma.done.wait [#allocation4], 256  }
  0x53   :  { %410 = vsyncadd [#allocation4], 4294967040 }
  0x54   :  { %337 = vsyncpa [#allocation3], 1 }
  0x55   :  { %338 = vsyncpa [#allocation6], 1 }
  0x56   :  { %339 = vsyncpa [#allocation4], 1 }

</bundles_post_ra>
